<compile_context>
chip_gen: v5e
topology: v5e:2x2
jax: 0.10.0
libtpu: 0.0.40
codegen_flags: <defaults>
</compile_context>

<pallas_src>
import jax
import jax.numpy as jnp
from jax.experimental import pallas as pl
from jax.experimental.pallas import tpu as pltpu


_MAX_TILE_F = 8192  # split the feature (reduction) axis beyond this


def _round_up(n, m):
    return ((n + m - 1) // m) * m


def _logreg_kernel(x_ref, w_ref, b_ref, o_ref):
    # x_ref: (TILE_B, TILE_F) VMEM
    # w_ref: (1, TILE_F)      VMEM weight row (sublane-padded, not lane-padded)
    # b_ref: (1, 1)           SMEM scalar
    # o_ref: (TILE_B, 1)      VMEM f32 logits, resident across the F axis
    k = pl.program_id(1)

    @pl.when(k == 0)
    def _init():
        o_ref[...] = jnp.zeros_like(o_ref)

    # Row-wise dot on the MXU: contract x dim 1 with w dim 1 (== x @ w.T),
    # accumulating in f32 into the resident output block.
    o_ref[...] += jax.lax.dot_general(
        x_ref[...],
        w_ref[...],
        dimension_numbers=(((1,), (1,)), ((), ())),
        preferred_element_type=jnp.float32,
    )

    @pl.when(k == pl.num_programs(1) - 1)
    def _finalize():
        o_ref[...] += b_ref[0, 0]
    # TODO(synk): fold sigmoid back in-kernel on a lane-dense
    # (tile_b//128, 128) output block once the (tile_b,1)->(tile_b//128,128)
    # relayout is confirmed supported by Mosaic.


def logistic_regression(x, weight, bias, *, tile_b=None):
    """x: (B, F), weight: (1, F), bias: (1,)  ->  sigmoid(x @ W^T + b): (B, 1)."""
    B, F = x.shape
    out_dtype = x.dtype
    itemsize = jnp.dtype(x.dtype).itemsize

    # ---- generation-aware VMEM budget -------------------------------------
    try:
        info = pltpu.get_tpu_info()
        vmem_cap = int(getattr(info, "vmem_capacity_bytes", 64 * 2**20))
    except Exception:
        vmem_cap = 64 * 2**20
    if vmem_cap >= 100 * 2**20:       # v5e / v6e: 128 MiB VMEM per core
        x_block_target = 16 * 2**20   # per-buffer x block (double-buffered)
        vmem_limit = 64 * 2**20
    else:                             # v7x: 64 MiB per TensorCore
        x_block_target = 8 * 2**20
        vmem_limit = 40 * 2**20

    # ---- feature (reduction) tiling ----------------------------------------
    if F <= _MAX_TILE_F:
        tile_f, padded_f = F, F
    else:
        tile_f = _MAX_TILE_F
        padded_f = _round_up(F, tile_f)
        # TODO(synk): handle a ragged last feature block instead of the
        # wrapper-side zero-pad copy of x along F.

    weight_row = weight.reshape(1, F).astype(x.dtype)
    if padded_f != F:
        x = jnp.pad(x, ((0, 0), (0, padded_f - F)))
        weight_row = jnp.pad(weight_row, ((0, 0), (0, padded_f - F)))

    # ---- batch tiling: byte-targeted (no fixed row cap) --------------------
    if tile_b is None:
        rows = max(8, x_block_target // (tile_f * itemsize))
        tile_b = (rows // 8) * 8
    tile_b = max(8, (min(tile_b, _round_up(B, 8)) // 8) * 8)
    # Guarantee >= 2 batch grid steps when possible so the "parallel" axis can
    # be sharded across TensorCores (v7x megacore); harmless elsewhere.
    if B >= 16 and _round_up(B, tile_b) // tile_b < 2:
        tile_b = max(8, _round_up((B + 1) // 2, 8))

    padded_b = _round_up(B, tile_b)
    if padded_b != B:
        x = jnp.pad(x, ((0, padded_b - B), (0, 0)))

    grid = (padded_b // tile_b, padded_f // tile_f)
    bias2d = bias.reshape(1, 1).astype(jnp.float32)

    logits = pl.pallas_call(
        _logreg_kernel,
        out_shape=jax.ShapeDtypeStruct((padded_b, 1), jnp.float32),
        grid=grid,
        in_specs=[
            # Batch- and feature-tiled x: auto-pipelined / double-buffered.
            pl.BlockSpec((tile_b, tile_f), lambda i, k: (i, k)),
            # Weight row chunk; constant index along i -> resident when F fits.
            pl.BlockSpec((1, tile_f), lambda i, k: (0, k)),
            # Bias: scalar in SMEM (no VMEM tile / broadcast DMA).
            pl.BlockSpec(memory_space=pltpu.MemorySpace.SMEM),
        ],
        out_specs=pl.BlockSpec((tile_b, 1), lambda i, k: (i, 0)),
        compiler_params=pltpu.CompilerParams(
            dimension_semantics=("parallel", "arbitrary"),
            vmem_limit_bytes=vmem_limit,
        ),
    )(x, weight_row, bias2d)

    # Sigmoid on the tiny (B, 1) logits here keeps the in-kernel epilogue off
    # the EUP column path (tile_b/8 single-useful-lane vregs per tile).
    return jax.nn.sigmoid(logits[:B]).astype(out_dtype)


def _reference(x, weight, bias):
    return jax.nn.sigmoid(x @ weight.T + bias)


if __name__ == "__main__":
    key = jax.random.PRNGKey(0)
    k_x, k_w, k_b, k_x2 = jax.random.split(key, 4)

    # Small case (matches toy module usage).
    B, F = 8, 32
    bound = 1.0 / jnp.sqrt(jnp.float32(F))
    x = jax.random.normal(k_x, (B, F), dtype=jnp.float32)
    weight = jax.random.uniform(k_w, (1, F), jnp.float32, -bound, bound)
    bias = jax.random.uniform(k_b, (1,), jnp.float32, -bound, bound)

    y = logistic_regression(x, weight, bias)
    jax.block_until_ready(y)
    assert y.shape == (B, 1)
    assert jnp.allclose(y, _reference(x, weight, bias), atol=2e-5, rtol=2e-5)

    # Larger, non-multiple-of-tile batch: exercises batch tiling, padding and
    # the >=2-grid-step (megacore) path.
    B2, F2 = 300, 128
    bound2 = 1.0 / jnp.sqrt(jnp.float32(F2))
    x2 = jax.random.normal(k_x2, (B2, F2), dtype=jnp.float32)
    w2 = jax.random.uniform(k_w, (1, F2), jnp.float32, -bound2, bound2)
    b2 = jax.random.uniform(k_b, (1,), jnp.float32, -bound2, bound2)

    y2 = logistic_regression(x2, w2, b2)
    jax.block_until_ready(y2)
    assert y2.shape == (B2, 1)
    assert jnp.allclose(y2, _reference(x2, w2, b2), atol=2e-5, rtol=2e-5)

    print("KERNEL_OK")
</pallas_src>

<mosaic_0001>
module attributes {stable_mosaic.version = 11 : i64} {
  func.func @_logreg_kernel(%arg0: i32, %arg1: i32, %arg2: memref<8x32xf32, #tpu.memory_space<vmem>>, %arg3: memref<1x32xf32, #tpu.memory_space<vmem>>, %arg4: memref<1x1xf32, #tpu.memory_space<smem>>, %arg5: memref<8x1xf32, #tpu.memory_space<vmem>>) attributes {dimension_semantics = [#tpu.dimension_semantics<parallel>, #tpu.dimension_semantics<arbitrary>], iteration_bounds = array<i64: 1, 1>, scalar_prefetch = 0 : i64, scratch_operands = 0 : i64, tpu.core_type = #tpu.core_type<tc>, window_params = [{transform_indices = @transform_0, window_bounds = array<i64: 8, 32>}, {transform_indices = @transform_1, window_bounds = array<i64: 1, 32>}, {transform_indices = @transform_2, window_bounds = array<i64: 1, 1>}, {transform_indices = @transform_3, window_bounds = array<i64: 8, 1>}]} {
    %c0_i32 = arith.constant 0 : i32
    %0 = arith.cmpi eq, %arg1, %c0_i32 : i32
    %1 = arith.extui %0 : i1 to i32
    %c0_i32_0 = arith.constant 0 : i32
    %2 = arith.cmpi ne, %1, %c0_i32_0 : i32
    scf.if %2 {
      %cst_10 = arith.constant 0.000000e+00 : f32
      %12 = vector.broadcast %cst_10 : f32 to vector<8x1xf32>
      %c0_11 = arith.constant 0 : index
      %c0_12 = arith.constant 0 : index
      %13 = vector.load %arg5[%c0_11, %c0_12] : memref<8x1xf32, #tpu.memory_space<vmem>>, vector<8x1xf32>
      tpu.vector_store %arg5[%c0_11, %c0_12], %12 {strides = array<i32>} : memref<8x1xf32, #tpu.memory_space<vmem>>, vector<8x1xf32>,
    } else {
    }
    %c0 = arith.constant 0 : index
    %c0_1 = arith.constant 0 : index
    %3 = vector.load %arg5[%c0, %c0_1] : memref<8x1xf32, #tpu.memory_space<vmem>>, vector<8x1xf32>
    %c0_2 = arith.constant 0 : index
    %c0_3 = arith.constant 0 : index
    %4 = vector.load %arg2[%c0_2, %c0_3] : memref<8x32xf32, #tpu.memory_space<vmem>>, vector<8x32xf32>
    %c0_4 = arith.constant 0 : index
    %c0_5 = arith.constant 0 : index
    %5 = vector.load %arg3[%c0_4, %c0_5] : memref<1x32xf32, #tpu.memory_space<vmem>>, vector<1x32xf32>
    %cst = arith.constant dense<0.000000e+00> : vector<8x1xf32>
    %6 = tpu.matmul %4, %5, %cst {dimension_numbers = #tpu.dot_dimension_numbers<[1], [1], [0], [0], [0, 0, 1, 0], [], []>} : vector<8x32xf32>, vector<1x32xf32>, vector<8x1xf32> -> vector<8x1xf32>
    %7 = arith.addf %3, %6 : vector<8x1xf32>
    %c0_6 = arith.constant 0 : index
    %c0_7 = arith.constant 0 : index
    %8 = vector.load %arg5[%c0_6, %c0_7] : memref<8x1xf32, #tpu.memory_space<vmem>>, vector<8x1xf32>
    tpu.vector_store %arg5[%c0_6, %c0_7], %7 {strides = array<i32>} : memref<8x1xf32, #tpu.memory_space<vmem>>, vector<8x1xf32>,
    %c0_i32_8 = arith.constant 0 : i32
    %9 = arith.cmpi eq, %arg1, %c0_i32_8 : i32
    %10 = arith.extui %9 : i1 to i32
    %c0_i32_9 = arith.constant 0 : i32
    %11 = arith.cmpi ne, %10, %c0_i32_9 : i32
    scf.if %11 {
      %c0_10 = arith.constant 0 : index
      %c0_11 = arith.constant 0 : index
      %12 = vector.load %arg5[%c0_10, %c0_11] : memref<8x1xf32, #tpu.memory_space<vmem>>, vector<8x1xf32>
      %c0_12 = arith.constant 0 : index
      %c0_13 = arith.constant 0 : index
      %13 = memref.load %arg4[%c0_12, %c0_13] : memref<1x1xf32, #tpu.memory_space<smem>>
      %14 = vector.broadcast %13 : f32 to vector<8x1xf32>
      %15 = arith.addf %12, %14 : vector<8x1xf32>
      %c0_14 = arith.constant 0 : index
      %c0_15 = arith.constant 0 : index
      %16 = vector.load %arg5[%c0_14, %c0_15] : memref<8x1xf32, #tpu.memory_space<vmem>>, vector<8x1xf32>
      tpu.vector_store %arg5[%c0_14, %c0_15], %15 {strides = array<i32>} : memref<8x1xf32, #tpu.memory_space<vmem>>, vector<8x1xf32>,
    } else {
    }
    return
  }
  func.func @transform_0(%arg0: i32, %arg1: i32) -> (i32, i32) {
    %c0_i32 = arith.constant 0 : i32
    return %arg0, %arg1 : i32, i32
  }
  func.func @transform_1(%arg0: i32, %arg1: i32) -> (i32, i32) {
    %c0_i32 = arith.constant 0 : i32
    %c0_i32_0 = arith.constant 0 : i32
    return %c0_i32, %arg1 : i32, i32
  }
  func.func @transform_2(%arg0: i32, %arg1: i32) -> (i32, i32) {
    %c0_i32 = arith.constant 0 : i32
    %c0_i32_0 = arith.constant 0 : i32
    %c0_i32_1 = arith.constant 0 : i32
    return %c0_i32, %c0_i32_0 : i32, i32
  }
  func.func @transform_3(%arg0: i32, %arg1: i32) -> (i32, i32) {
    %c0_i32 = arith.constant 0 : i32
    %c0_i32_0 = arith.constant 0 : i32
    return %arg0, %c0_i32 : i32, i32
  }
}

</mosaic_0001>

<bundles_post_ra>
// kernel: tpu_custom_call.1
= control target key start
LH: loop header
LB: loop body
LE: loop exit
PB: predicated region body
PF: predicated region fallthrough
CT: control target
= control target key end

     0   :  { %9 = vsyncpa [#allocation4], 0  ;;  %s91_s15 = smov [#allocation3]   ;;  %s140_s0 = inlined_call_operand.hbm [shape: f32[8,32], index: 0, kind: input, shape index: {}]   ;;  %s141_s1 = inlined_call_operand.vmem [shape: f32[1,32], index: 1, kind: input, shape index: {}]   ;;  %s142_s2 = inlined_call_operand.<no memory space> [shape: f32[1,1], index: 2, kind: input, shape index: {}]   ;;  %s143_s3 = inlined_call_operand.vmem [shape: f32[8,1], index: 3, kind: output, shape index: {}]  }
   0x1   :  { %s15_s14 = sshll.u32 %s140_s0, 4  ;;  %s17_s16 = sshll.u32 %s91_s15, 4  ;;  %s16_s14 = int_to_ptr.hbm [resolvable:$true] %s15_s14  ;;  %s18_s16 = int_to_ptr.vmem [resolvable:$true] %s17_s16 }
   0x2   :  { %20 = dma.hbm_to_vmem [thread:$0]  %s16_s14, 128, %s18_s16, [#allocation4]  }
   0x3   :  { %89 = dma.done.wait [#allocation4], 128  }
   0x4   :  { %90 = vsyncadd [#allocation4], 4294967168  ;;  %vm33_vm0 = vcmask 7168   ;;  %v92_v0 = vmov 0.0   ;;  %v36_v1 = vld [vmem:[#allocation3] sm:$0xff]  ;;  %vm42_vm1 = vcmask 261120   ;;  %v54_v8 = vstv %s142_s2 }
   0x5   :  { %34 = vst.msk [vmem:[%s143_s3] sm:$0xff] %vm33_vm0, %v92_v0  ;;  %v64_v2 = vld [vmem:[%s141_s1] ss:$0 sm:$0xff] }
   0x6   :  { %v41_v3 = vmul.f32 %v64_v2, %v36_v1 }
   0x8   :  { %v43_v4 = vsel %vm42_vm1, %v41_v3, 0.0 }
   0x9   :  { %44 = vadd.xlane.f32.xlu0 %v43_v4 }
   0xc   :  { %v35_v5 = vld [vmem:[%s143_s3] sm:$0xff] }
  0x7c   :  { %v45_v6 = vpop.xlane.xlu0 %44 }
  0x7d   :  { %v46_v7 = vadd.f32 %v45_v6, %v35_v5 }
  0x7f   :  { %48 = vst.msk [vmem:[%s143_s3] sm:$0xff] %vm33_vm0, %v46_v7 }
  0x86   :  { %v52_v9 = vld [vmem:[%s143_s3] sm:$0xff] }
  0x87   :  { %v55_v10 = vadd.f32 %v54_v8, %v52_v9 }
  0x89   :  { %56 = vst.msk [vmem:[%s143_s3] sm:$0xff] %vm33_vm0, %v55_v10 }
  0x8a   :  { %61 = vsyncpa [#allocation4], 1 }

</bundles_post_ra>
